<compile_context>
chip_gen: v7x
topology: tpu7x:2x2x1
jax: 0.10.0
libtpu: 0.0.40
codegen_flags: <defaults>
</compile_context>

<pallas_src>
import jax
import jax.numpy as jnp
from jax.experimental import pallas as pl
from jax.experimental.pallas import tpu as pltpu


def _round_up(x, m):
    return ((x + m - 1) // m) * m


# ---------------------------------------------------------------------------
# Fused forward kernel: (Linear -> ReLU)^(L-1) -> Linear -> masked row-softmax
# ---------------------------------------------------------------------------
def _make_fused_kernel(num_layers, dout_final):
    """refs = (x_ref, w0_ref, ..., w{L-1}_ref, o_ref); all weights [Din_pad, Dout_pad]."""

    def kernel(*refs):
        x_ref = refs[0]
        w_refs = refs[1:1 + num_layers]
        o_ref = refs[1 + num_layers]

        h = x_ref[...]
        # Hidden layers: Linear (bias-free) -> ConsistentDropout(eval)=identity -> ReLU.
        # Activations stay on-chip the whole time.
        for w_ref in w_refs[:-1]:
            y = jnp.dot(h, w_ref[...], preferred_element_type=jnp.float32)
            h = jnp.maximum(y, 0.0)

        # Final layer: Linear -> Softmax(dim=1). Padded lanes (>= dout_final) are masked out.
        logits = jnp.dot(h, w_refs[-1][...], preferred_element_type=jnp.float32)
        col = jax.lax.broadcasted_iota(jnp.int32, logits.shape, 1)
        valid = col < dout_final
        logits = jnp.where(valid, logits, -1e30)
        m = jnp.max(logits, axis=1, keepdims=True)
        e = jnp.where(valid, jnp.exp(logits - m), 0.0)
        denom = jnp.sum(e, axis=1, keepdims=True)
        o_ref[...] = (e * pl.reciprocal(denom, approx=True)).astype(o_ref.dtype)

    return kernel


# ---------------------------------------------------------------------------
# FCNet: parameter construction (he_uniform, bias-free) + fused forward
# ---------------------------------------------------------------------------
class FCNetPallas:
    def __init__(self, layer_sizes, key, init="he_uniform", dtype=jnp.float32):
        assert init == "he_uniform"
        self.layer_sizes = list(layer_sizes)
        self.dtype = dtype

        # Raw torch-convention weights [out_features, in_features] (kept for the reference path).
        self.weights = []
        for din, dout in zip(layer_sizes[:-1], layer_sizes[1:]):
            key, sub = jax.random.split(key)
            limit = (6.0 / din) ** 0.5
            w = jax.random.uniform(sub, (dout, din), jnp.float32, minval=-limit, maxval=limit)
            self.weights.append(w)

        # Kernel weights: pre-transposed to [Din_pad, Dout_pad], zero-padded ONCE here.
        #   Dout_pad = round_up(Dout, 128)  -> lane-dense outputs / full MXU columns.
        #   Din_pad of layer l = Dout_pad of layer l-1 (layer 0 keeps the raw input dim).
        self.kernel_weights = []
        din_pad = layer_sizes[0]
        for w in self.weights:
            dout, din = w.shape
            dout_pad = _round_up(dout, 128)
            wt = jnp.zeros((din_pad, dout_pad), dtype)
            wt = wt.at[:din, :dout].set(w.T.astype(dtype))
            self.kernel_weights.append(wt)
            din_pad = dout_pad

        self.dout_final = layer_sizes[-1]
        self.dout_final_pad = self.kernel_weights[-1].shape[1]

    def forward(self, x):
        B, D0 = x.shape
        assert D0 == self.layer_sizes[0]
        num_layers = len(self.kernel_weights)

        # Batch tiling: TB rows per grid step (multiple of 8 sublanes); 'parallel' grid axis.
        TB = 128 if B >= 128 else _round_up(B, 8)
        B_pad = _round_up(B, TB)
        x_in = x.astype(self.dtype)
        if B_pad != B:
            x_in = jnp.pad(x_in, ((0, B_pad - B), (0, 0)))

        kernel = _make_fused_kernel(num_layers, self.dout_final)

        in_specs = [pl.BlockSpec((TB, D0), lambda i: (i, 0))]
        for wt in self.kernel_weights:
            # Full-array block, constant index_map -> weight stays resident across grid steps.
            in_specs.append(pl.BlockSpec(wt.shape, lambda i: (0, 0)))
        out_spec = pl.BlockSpec((TB, self.dout_final_pad), lambda i: (i, 0))

        out_pad = pl.pallas_call(
            kernel,
            out_shape=jax.ShapeDtypeStruct((B_pad, self.dout_final_pad), self.dtype),
            grid=(B_pad // TB,),
            in_specs=in_specs,
            out_specs=out_spec,
            compiler_params=pltpu.CompilerParams(
                dimension_semantics=("parallel",)),
        )(x_in, *self.kernel_weights)

        return out_pad[:B, : self.dout_final]

    # Pure-JAX reference for correctness checking (exact division, unpadded).
    def forward_ref(self, x):
        h = x
        for w in self.weights[:-1]:
            h = jnp.maximum(h @ w.T, 0.0)
        return jax.nn.softmax(h @ self.weights[-1].T, axis=1)


if __name__ == "__main__":
    key = jax.random.PRNGKey(0)
    layer_sizes = [32, 64, 48, 16]   # two hidden FC blocks + final softmax layer
    batch = 8

    key, kx, kw = jax.random.split(key, 3)
    x = jax.random.normal(kx, (batch, layer_sizes[0]), dtype=jnp.float32)

    net = FCNetPallas(layer_sizes, kw)

    out = net.forward(x)
    out = jax.block_until_ready(out)

    ref = net.forward_ref(x)
    assert out.shape == (batch, layer_sizes[-1])
    # Tolerance accounts for the EUP approximate reciprocal in the softmax denominator.
    assert jnp.allclose(out, ref, atol=2e-3, rtol=2e-3), "Pallas output mismatch vs JAX reference"
    assert jnp.allclose(jnp.sum(out, axis=1), 1.0, atol=2e-3), "softmax rows must sum to ~1"

    print("KERNEL_OK")
</pallas_src>

<mosaic_0001>
module attributes {stable_mosaic.version = 11 : i64} {
  func.func @kernel(%arg0: i32, %arg1: memref<8x32xf32, #tpu.memory_space<vmem>>, %arg2: memref<32x128xf32, #tpu.memory_space<vmem>>, %arg3: memref<128x128xf32, #tpu.memory_space<vmem>>, %arg4: memref<128x128xf32, #tpu.memory_space<vmem>>, %arg5: memref<8x128xf32, #tpu.memory_space<vmem>>) attributes {dimension_semantics = [#tpu.dimension_semantics<parallel>], iteration_bounds = array<i64: 1>, scalar_prefetch = 0 : i64, scratch_operands = 0 : i64, tpu.core_type = #tpu.core_type<tc>, window_params = [{transform_indices = @transform_0, window_bounds = array<i64: 8, 32>}, {pipeline_mode = #tpu.pipeline_mode<synchronous>, transform_indices = @transform_1, window_bounds = array<i64: 32, 128>}, {pipeline_mode = #tpu.pipeline_mode<synchronous>, transform_indices = @transform_2, window_bounds = array<i64: 128, 128>}, {pipeline_mode = #tpu.pipeline_mode<synchronous>, transform_indices = @transform_3, window_bounds = array<i64: 128, 128>}, {transform_indices = @transform_4, window_bounds = array<i64: 8, 128>}]} {
    %c0 = arith.constant 0 : index
    %c0_0 = arith.constant 0 : index
    %0 = vector.load %arg1[%c0, %c0_0] : memref<8x32xf32, #tpu.memory_space<vmem>>, vector<8x32xf32>
    %c0_1 = arith.constant 0 : index
    %c0_2 = arith.constant 0 : index
    %1 = vector.load %arg2[%c0_1, %c0_2] : memref<32x128xf32, #tpu.memory_space<vmem>>, vector<32x128xf32>
    %cst = arith.constant dense<0.000000e+00> : vector<8x128xf32>
    %2 = tpu.matmul %0, %1, %cst {dimension_numbers = #tpu.dot_dimension_numbers<[1], [0], [0], [1], [0, 0, 1, 1], [], []>} : vector<8x32xf32>, vector<32x128xf32>, vector<8x128xf32> -> vector<8x128xf32>
    %cst_3 = arith.constant 0.000000e+00 : f32
    %3 = vector.broadcast %cst_3 : f32 to vector<8x128xf32>
    %4 = arith.maximumf %2, %3 : vector<8x128xf32>
    %c0_4 = arith.constant 0 : index
    %c0_5 = arith.constant 0 : index
    %5 = vector.load %arg3[%c0_4, %c0_5] : memref<128x128xf32, #tpu.memory_space<vmem>>, vector<128x128xf32>
    %cst_6 = arith.constant dense<0.000000e+00> : vector<8x128xf32>
    %6 = tpu.matmul %4, %5, %cst_6 {dimension_numbers = #tpu.dot_dimension_numbers<[1], [0], [0], [1], [0, 0, 1, 1], [], []>} : vector<8x128xf32>, vector<128x128xf32>, vector<8x128xf32> -> vector<8x128xf32>
    %cst_7 = arith.constant 0.000000e+00 : f32
    %7 = vector.broadcast %cst_7 : f32 to vector<8x128xf32>
    %8 = arith.maximumf %6, %7 : vector<8x128xf32>
    %c0_8 = arith.constant 0 : index
    %c0_9 = arith.constant 0 : index
    %9 = vector.load %arg4[%c0_8, %c0_9] : memref<128x128xf32, #tpu.memory_space<vmem>>, vector<128x128xf32>
    %cst_10 = arith.constant dense<0.000000e+00> : vector<8x128xf32>
    %10 = tpu.matmul %8, %9, %cst_10 {dimension_numbers = #tpu.dot_dimension_numbers<[1], [0], [0], [1], [0, 0, 1, 1], [], []>} : vector<8x128xf32>, vector<128x128xf32>, vector<8x128xf32> -> vector<8x128xf32>
    %11 = tpu.iota {dimensions = array<i32: 1>} : vector<8x128xi32>
    %c16_i32 = arith.constant 16 : i32
    %12 = vector.broadcast %c16_i32 : i32 to vector<8x128xi32>
    %13 = arith.cmpi slt, %11, %12 : vector<8x128xi32>
    %cst_11 = arith.constant -1.000000e+30 : f32
    %14 = vector.broadcast %cst_11 : f32 to vector<8x128xf32>
    %15 = arith.select %13, %10, %14 : vector<8x128xi1>, vector<8x128xf32>
    %cst_12 = arith.constant dense<0xFF800000> : vector<8xf32>
    %16 = vector.multi_reduction <maximumf>, %15, %cst_12 [1] : vector<8x128xf32> to vector<8xf32>
    %17 = vector.shape_cast %16 : vector<8xf32> to vector<8x1xf32>
    %18 = vector.broadcast %17 : vector<8x1xf32> to vector<8x128xf32>
    %19 = arith.subf %15, %18 : vector<8x128xf32>
    %20 = math.exp %19 : vector<8x128xf32>
    %cst_13 = arith.constant 0.000000e+00 : f32
    %21 = vector.broadcast %cst_13 : f32 to vector<8x128xf32>
    %22 = arith.select %13, %20, %21 : vector<8x128xi1>, vector<8x128xf32>
    %cst_14 = arith.constant dense<0.000000e+00> : vector<8xf32>
    %23 = vector.multi_reduction <add>, %22, %cst_14 [1] : vector<8x128xf32> to vector<8xf32>
    %24 = vector.shape_cast %23 : vector<8xf32> to vector<8x1xf32>
    %25 = tpu.reciprocal %24 {approx = true} : vector<8x1xf32> -> vector<8x1xf32>
    %26 = vector.broadcast %25 : vector<8x1xf32> to vector<8x128xf32>
    %27 = arith.mulf %22, %26 : vector<8x128xf32>
    %c0_15 = arith.constant 0 : index
    %c0_16 = arith.constant 0 : index
    %28 = vector.load %arg5[%c0_15, %c0_16] : memref<8x128xf32, #tpu.memory_space<vmem>>, vector<8x128xf32>
    tpu.vector_store %arg5[%c0_15, %c0_16], %27 {strides = array<i32>} : memref<8x128xf32, #tpu.memory_space<vmem>>, vector<8x128xf32>,
    return
  }
  func.func @transform_0(%arg0: i32) -> (i32, i32) {
    %c0_i32 = arith.constant 0 : i32
    %c0_i32_0 = arith.constant 0 : i32
    return %arg0, %c0_i32 : i32, i32
  }
  func.func @transform_1(%arg0: i32) -> (i32, i32) {
    %c0_i32 = arith.constant 0 : i32
    %c0_i32_0 = arith.constant 0 : i32
    %c0_i32_1 = arith.constant 0 : i32
    return %c0_i32, %c0_i32_0 : i32, i32
  }
  func.func @transform_2(%arg0: i32) -> (i32, i32) {
    %c0_i32 = arith.constant 0 : i32
    %c0_i32_0 = arith.constant 0 : i32
    %c0_i32_1 = arith.constant 0 : i32
    return %c0_i32, %c0_i32_0 : i32, i32
  }
  func.func @transform_3(%arg0: i32) -> (i32, i32) {
    %c0_i32 = arith.constant 0 : i32
    %c0_i32_0 = arith.constant 0 : i32
    %c0_i32_1 = arith.constant 0 : i32
    return %c0_i32, %c0_i32_0 : i32, i32
  }
  func.func @transform_4(%arg0: i32) -> (i32, i32) {
    %c0_i32 = arith.constant 0 : i32
    %c0_i32_0 = arith.constant 0 : i32
    return %arg0, %c0_i32 : i32, i32
  }
}

</mosaic_0001>

<bundles_post_ra>
// kernel: tpu_custom_call.1
= control target key start
LH: loop header
LB: loop body
LE: loop exit
PB: predicated region body
PF: predicated region fallthrough
CT: control target
= control target key end

     0   :  { %9 = vsyncpa [#allocation3], 0  ;;  %s788_s0 = inlined_call_operand.hbm [shape: f32[8,32], index: 0, kind: input, shape index: {}]   ;;  %s789_s1 = inlined_call_operand.hbm [shape: f32[32,128], index: 1, kind: input, shape index: {}]   ;;  %s790_s2 = inlined_call_operand.hbm [shape: f32[128,128], index: 2, kind: input, shape index: {}]   ;;  %s791_s3 = inlined_call_operand.hbm [shape: f32[128,128], index: 3, kind: input, shape index: {}]   ;;  %s792_s4 = inlined_call_operand.hbm [shape: f32[8,128], index: 4, kind: output, shape index: {}]  }
   0x1   :  { %10 = vsyncpa [#allocation6], 0 }
   0x2   :  { %11 = vsyncpa [#allocation9], 0 }
   0x3   :  { %12 = vsyncpa [#allocation4], 0  ;;  %s663_s15 = smov [#allocation5]   ;;  %s545_s19 = scalar_lea.hbm %s789_s1, 512 }
   0x4   :  { %s28_s16 = sshll.u32 %s663_s15, 4  ;;  %p546_p0 = scmp.ne.s32.totalorder %s789_s1, %s545_s19  ;;  %s29_s16 = int_to_ptr.vmem [resolvable:$true] %s28_s16 }
   0x5   :  { %p549_p1 = scmp.lt.u32.totalorder %s545_s19, %s789_s1 }
   0x7   :  { %p551_p2 = pnand %p549_p1, %p546_p0 }
   0x9   :  { %554 = shalt.err (!%p551_p2)
}
   0xa   :  { %s555_s24 = scalar_lea.vmem %s29_s16, 512  ;;  %p560_p4 = scmp.lt.s32.totalorder %s29_s16, %s29_s16 }
   0xb   :  { %p556_p3 = scmp.ne.s32.totalorder %s29_s16, %s555_s24  ;;  %p561_p5 = scmp.lt.s32.totalorder %s555_s24, %s555_s24 }
   0xd   :  { %p562_p6 = por %p561_p5, %p560_p4 }
   0xf   :  { %p563_p7 = pnand %p562_p6, %p556_p3 }
  0x11   :  { %566 = shalt.err (!%p563_p7)
}
  0x12   :  { %s664_s25 = smov 128   ;;  %s665_s26 = smov 8  }
  0x13   :  { %34 = dma.hbm_to_vmem [thread:$0]  %s789_s1, 512, %s29_s16, [#allocation6], %s664_s25, %s664_s25, %s665_s26  }
  0x14   :  { %s666_s29 = smov [#allocation2]   ;;  %s667_s5 = smov [#allocation7]  }
  0x15   :  { %s19_s30 = sshll.u32 %s666_s29, 4  ;;  %s40_s6 = sshll.u32 %s667_s5, 4  ;;  %s20_s30 = int_to_ptr.vmem [resolvable:$true] %s19_s30  ;;  %s41_s6 = int_to_ptr.vmem [resolvable:$true] %s40_s6 }
  0x16   :  { %s567_s9 = scalar_lea.hbm %s788_s0, 128 }
  0x17   :  { %p568_p8 = scmp.ne.s32.totalorder %s788_s0, %s567_s9  ;;  %p571_p9 = scmp.lt.u32.totalorder %s567_s9, %s788_s0 }
  0x19   :  { %p573_p10 = pnand %p571_p9, %p568_p8 }
  0x1b   :  { %576 = shalt.err (!%p573_p10)
}
  0x1c   :  { %s577_s1 = scalar_lea.vmem %s20_s30, 128  ;;  %p582_p12 = scmp.lt.s32.totalorder %s20_s30, %s20_s30 }
  0x1d   :  { %p578_p11 = scmp.ne.s32.totalorder %s20_s30, %s577_s1  ;;  %p583_p13 = scmp.lt.s32.totalorder %s577_s1, %s577_s1 }
  0x1f   :  { %p584_p0 = por %p583_p13, %p582_p12 }
  0x21   :  { %p585_p1 = pnand %p584_p0, %p578_p11 }
  0x23   :  { %588 = shalt.err (!%p585_p1)
}
  0x24   :  { %22 = dma.hbm_to_vmem [thread:$0]  %s788_s0, 128, %s20_s30, [#allocation3]  }
  0x25   :  { %s589_s18 = scalar_lea.hbm %s790_s2, 2048 }
  0x26   :  { %p590_p2 = scmp.ne.s32.totalorder %s790_s2, %s589_s18  ;;  %p593_p3 = scmp.lt.u32.totalorder %s589_s18, %s790_s2 }
  0x28   :  { %p595_p4 = pnand %p593_p3, %p590_p2 }
  0x2a   :  { %598 = shalt.err (!%p595_p4)
}
  0x2b   :  { %s599_s23 = scalar_lea.vmem %s41_s6, 2048  ;;  %p604_p6 = scmp.lt.s32.totalorder %s41_s6, %s41_s6 }
  0x2c   :  { %p600_p5 = scmp.ne.s32.totalorder %s41_s6, %s599_s23  ;;  %p605_p7 = scmp.lt.s32.totalorder %s599_s23, %s599_s23 }
  0x2e   :  { %p606_p8 = por %p605_p7, %p604_p6 }
  0x30   :  { %p607_p9 = pnand %p606_p8, %p600_p5 }
  0x32   :  { %610 = shalt.err (!%p607_p9)
}
  0x33   :  { %46 = dma.hbm_to_vmem [thread:$0]  %s790_s2, 2048, %s41_s6, [#allocation6], %s664_s25, %s664_s25, %s665_s26  }
  0x34   :  { %s668_s27 = smov [#allocation8]   ;;  %s611_s5 = scalar_lea.hbm %s791_s3, 2048 }
  0x35   :  { %s52_s28 = sshll.u32 %s668_s27, 4  ;;  %p612_p10 = scmp.ne.s32.totalorder %s791_s3, %s611_s5  ;;  %s53_s28 = int_to_ptr.vmem [resolvable:$true] %s52_s28 }
  0x36   :  { %p615_p11 = scmp.lt.u32.totalorder %s611_s5, %s791_s3 }
  0x38   :  { %p617_p12 = pnand %p615_p11, %p612_p10 }
  0x3a   :  { %620 = shalt.err (!%p617_p12)
}
  0x3b   :  { %s621_s11 = scalar_lea.vmem %s53_s28, 2048  ;;  %p626_p0 = scmp.lt.s32.totalorder %s53_s28, %s53_s28 }
  0x3c   :  { %p622_p13 = scmp.ne.s32.totalorder %s53_s28, %s621_s11  ;;  %p627_p1 = scmp.lt.s32.totalorder %s621_s11, %s621_s11 }
  0x3e   :  { %p628_p2 = por %p627_p1, %p626_p0 }
  0x40   :  { %p629_p3 = pnand %p628_p2, %p622_p13 }
  0x42   :  { %632 = shalt.err (!%p629_p3)
}
  0x43   :  { %58 = dma.hbm_to_vmem [thread:$0]  %s791_s3, 2048, %s53_s28, [#allocation9], %s664_s25, %s664_s25, %s665_s26  }
  0x44   :  { %655 = dma.done.wait [#allocation3], 128  }
  0x45   :  { %656 = vsyncadd [#allocation3], 4294967168 }
  0x46   :  { %657 = dma.done.wait [#allocation6], 2560  }
  0x47   :  { %658 = vsyncadd [#allocation6], 4294964736 }
  0x48   :  { %659 = dma.done.wait [#allocation9], 2048  }
  0x49   :  { %660 = vsyncadd [#allocation9], 4294965248  ;;  %v669_v0 = vmov 0.0|0.0   ;;  %vm670_vm0 = vmmov 0   ;;  %v671_v1 = vmov 0.0   ;;  %v72_v2 = vld [vmem:[#allocation5] sm:$0xff]  ;;  %v324_v63 = vlaneseq }
  0x4a   :  { %477 = vmatprep.subr.bf16.mxu0 %v669_v0  ;;  %404 = vmatprep.mubr.msk.f32.mxu0 %vm670_vm0, %v671_v1  ;;  %v73_v3 = vld [vmem:[#allocation5 + $0x8] sm:$0xff]  ;;  %v74_v4 = vld [vmem:[#allocation5 + $0x10] sm:$0xff]  ;;  %v75_v6 = vld [vmem:[#allocation5 + $0x18] sm:$0xff]  ;;  %vm76_vm1 = vcmask 261120   ;;  %s672_s3 = smov [#allocation10]  }
  0x4b   :  { %483 = vmatprep.subr.bf16.mxu1 %v669_v0  ;;  %439 = vmatprep.mubr.msk.f32.mxu1 %vm670_vm0, %v671_v1  ;;  %v478_v5 = vpack.c.bf16 %v73_v3, %v72_v2  ;;  %v151_v7 = vld [vmem:[#allocation7] sm:$0xff]  ;;  %v152_v8 = vld [vmem:[#allocation7 + $0x8] sm:$0xff]  ;;  %v153_v9 = vld [vmem:[#allocation7 + $0x10] sm:$0xff]  ;;  %v481_v11 = vpack.c.bf16 %v75_v6, %v74_v4  ;;  %s345_s25 = sshll.u32 %s672_s3, 4  ;;  %s346_s25 = int_to_ptr.vmem [resolvable:$true] %s345_s25 }
  0x4c   :  { %v154_v10 = vld [vmem:[#allocation7 + $0x18] sm:$0xff]  ;;  %v484_v12 = vpack.c.bf16 %v152_v8, %v151_v7  ;;  %v155_v14 = vld [vmem:[#allocation7 + $0x20] sm:$0xff]  ;;  %v156_v15 = vld [vmem:[#allocation7 + $0x28] sm:$0xff]  ;;  %s633_s26 = scalar_lea.vmem %s346_s25, 128  ;;  %p638_p5 = scmp.lt.s32.totalorder %s346_s25, %s346_s25 }
  0x4d   :  { %479 = vmatpush3.bf16.msra.mxu0 %v478_v5  ;;  %v487_v13 = vpack.c.bf16 %v154_v10, %v153_v9  ;;  %v71_v16 = vld [vmem:[#allocation2] sm:$0xff]  ;;  %v490_v17 = vpack.c.bf16 %v156_v15, %v155_v14  ;;  %v157_v18 = vld [vmem:[#allocation7 + $0x30] sm:$0xff]  ;;  %v159_v21 = vld [vmem:[#allocation7 + $0x40] sm:$0xff]  ;;  %p634_p4 = scmp.ne.s32.totalorder %s346_s25, %s633_s26  ;;  %p639_p6 = scmp.lt.s32.totalorder %s633_s26, %s633_s26 }
  0x4e   :  { %480 = vmatprep.subr.bf16.mxu0 %v669_v0  ;;  %485 = vmatpush3.bf16.msra.mxu1 %v484_v12  ;;  %v158_v19 = vld [vmem:[#allocation7 + $0x38] sm:$0xff]  ;;  %v160_v22 = vld [vmem:[#allocation7 + $0x48] sm:$0xff]  ;;  %v161_v24 = vld [vmem:[#allocation7 + $0x50] sm:$0xff] }
  0x4f   :  { %486 = vmatprep.subr.bf16.mxu1 %v669_v0  ;;  %v493_v20 = vpack.c.bf16 %v158_v19, %v157_v18  ;;  %v496_v23 = vpack.c.bf16 %v160_v22, %v159_v21  ;;  %v162_v25 = vld [vmem:[#allocation7 + $0x58] sm:$0xff]  ;;  %v163_v27 = vld [vmem:[#allocation7 + $0x60] sm:$0xff]  ;;  %v164_v28 = vld [vmem:[#allocation7 + $0x68] sm:$0xff]  ;;  %p640_p7 = por %p639_p6, %p638_p5 }
  0x50   :  { %v499_v26 = vpack.c.bf16 %v162_v25, %v161_v24  ;;  %v502_v29 = vpack.c.bf16 %v164_v28, %v163_v27  ;;  %v165_v30 = vld [vmem:[#allocation7 + $0x70] sm:$0xff]  ;;  %v166_v31 = vld [vmem:[#allocation7 + $0x78] sm:$0xff]  ;;  %v238_v33 = vld [vmem:[#allocation8] sm:$0xff] }
  0x51   :  { %482 = vmatpush3.bf16.msra.mxu0 %v481_v11  ;;  %v505_v32 = vpack.c.bf16 %v166_v31, %v165_v30  ;;  %v239_v34 = vld [vmem:[#allocation8 + $0x8] sm:$0xff]  ;;  %v240_v35 = vld [vmem:[#allocation8 + $0x10] sm:$0xff]  ;;  %v241_v37 = vld [vmem:[#allocation8 + $0x18] sm:$0xff]  ;;  %p641_p8 = pnand %p640_p7, %p634_p4 }
  0x52   :  { %507 = vmatprep.subr.bf16.mxu0 %v669_v0  ;;  %488 = vmatpush3.bf16.msra.mxu1 %v487_v13  ;;  %v508_v36 = vpack.c.bf16 %v239_v34, %v238_v33  ;;  %v511_v38 = vpack.c.bf16 %v241_v37, %v240_v35  ;;  %v242_v39 = vld [vmem:[#allocation8 + $0x20] sm:$0xff]  ;;  %v243_v40 = vld [vmem:[#allocation8 + $0x28] sm:$0xff]  ;;  %v244_v42 = vld [vmem:[#allocation8 + $0x30] sm:$0xff] }
  0x53   :  { %489 = vmatprep.subr.bf16.mxu1 %v669_v0  ;;  %v514_v41 = vpack.c.bf16 %v243_v40, %v242_v39  ;;  %v245_v43 = vld [vmem:[#allocation8 + $0x38] sm:$0xff]  ;;  %v246_v45 = vld [vmem:[#allocation8 + $0x40] sm:$0xff]  ;;  %v247_v46 = vld [vmem:[#allocation8 + $0x48] sm:$0xff] }
  0x54   :  { %405 = vmatmul.mubr.msk.f32.vlgmr.msra.gmra.mrb[0].mxu0 %vm76_vm1, %v71_v16  ;;  %v517_v44 = vpack.c.bf16 %v245_v43, %v244_v42  ;;  %v520_v47 = vpack.c.bf16 %v247_v46, %v246_v45  ;;  %v248_v48 = vld [vmem:[#allocation8 + $0x50] sm:$0xff]  ;;  %v249_v49 = vld [vmem:[#allocation8 + $0x58] sm:$0xff]  ;;  %v250_v51 = vld [vmem:[#allocation8 + $0x60] sm:$0xff] }
  0x55   :  { %474 = vmatprep.mubr.msk.f32.mxu0 %vm670_vm0, %v671_v1  ;;  %509 = vmatpush3.bf16.msra.mxu0 %v508_v36  ;;  %v523_v50 = vpack.c.bf16 %v249_v49, %v248_v48  ;;  %v251_v52 = vld [vmem:[#allocation8 + $0x68] sm:$0xff]  ;;  %v252_v57 = vld [vmem:[#allocation8 + $0x70] sm:$0xff]  ;;  %v253_v58 = vld [vmem:[#allocation8 + $0x78] sm:$0xff]  ;;  %v325_v1 = vand.u32 127, %v324_v63 }
  0x56   :  { %491 = vmatpush3.bf16.msra.mxu1 %v490_v17  ;;  %510 = vmatprep.subr.bf16.mxu0 %v669_v0  ;;  %v526_v53 = vpack.c.bf16 %v251_v52, %v250_v51  ;;  %v529_v59 = vpack.c.bf16 %v253_v58, %v252_v57 }
  0x57   :  { %492 = vmatprep.subr.bf16.mxu1 %v669_v0  ;;  %vm326_vm2 = vcmp.lt.s32.totalorder %v325_v1, 16 }
  0x59   :  { %512 = vmatpush3.bf16.msra.mxu0 %v511_v38 }
  0x5a   :  { %494 = vmatpush3.bf16.msra.mxu1 %v493_v20  ;;  %513 = vmatprep.subr.bf16.mxu0 %v669_v0 }
  0x5b   :  { %495 = vmatprep.subr.bf16.mxu1 %v669_v0 }
  0x5d   :  { %515 = vmatpush3.bf16.msra.mxu0 %v514_v41 }
  0x5e   :  { %497 = vmatpush3.bf16.msra.mxu1 %v496_v23  ;;  %516 = vmatprep.subr.bf16.mxu0 %v669_v0 }
  0x5f   :  { %498 = vmatprep.subr.bf16.mxu1 %v669_v0 }
  0x61   :  { %518 = vmatpush3.bf16.msra.mxu0 %v517_v44 }
  0x62   :  { %500 = vmatpush3.bf16.msra.mxu1 %v499_v26  ;;  %519 = vmatprep.subr.bf16.mxu0 %v669_v0 }
  0x63   :  { %501 = vmatprep.subr.bf16.mxu1 %v669_v0 }
  0x65   :  { %521 = vmatpush3.bf16.msra.mxu0 %v520_v47 }
  0x66   :  { %503 = vmatpush3.bf16.msra.mxu1 %v502_v29  ;;  %522 = vmatprep.subr.bf16.mxu0 %v669_v0 }
  0x67   :  { %504 = vmatprep.subr.bf16.mxu1 %v669_v0 }
  0x69   :  { %524 = vmatpush3.bf16.msra.mxu0 %v523_v50 }
  0x6a   :  { %506 = vmatpush3.bf16.msra.mxu1 %v505_v32  ;;  %525 = vmatprep.subr.bf16.mxu0 %v669_v0 }
  0x6d   :  { %527 = vmatpush3.bf16.msra.mxu0 %v526_v53 }
  0x6e   :  { %528 = vmatprep.subr.bf16.mxu0 %v669_v0 }
  0x71   :  { %530 = vmatpush3.bf16.msra.mxu0 %v529_v59 }
 0x127   :  { %v146_v54 = vpop.f32.mrb[0].mxu0 }
 0x128   :  { %v150_v55 = vmax.f32 %v146_v54, 0.0  ;;  %v406_v56 = vpop.f32.mrb[1].mxu0 }
 0x12a   :  { %440 = vmatmul.mubr.f32.vlgmr.msra.gmra.mrb[0].mxu1 %v150_v55 }
 0x1fd   :  { %v233_v60 = vpop.f32.mrb[0].mxu1 }
 0x1fe   :  { %v237_v61 = vmax.f32 %v233_v60, 0.0  ;;  %v441_v62 = vpop.f32.mrb[1].mxu1 }
 0x200   :  { %475 = vmatmul.mubr.f32.vlgmr.msra.gmra.mrb[2].mxu0 %v237_v61 }
 0x2d3   :  { %v320_v2 = vpop.f32.mrb[2].mxu0 }
 0x2d4   :  { %v476_v3 = vpop.f32.mrb[3].mxu0  ;;  %v327_v4 = vsel %vm326_vm2, %v320_v2, -1e+30 }
 0x2d5   :  { %328 = vmax.xlane.f32.xlu0 %v327_v4 }
 0x362   :  { %v329_v0 = vpop.xlane.xlu0 %328 }
 0x363   :  { %v330_v5 = vsub.f32 %v327_v4, %v329_v0 }
 0x365   :  { %v331_v6 = vmul.f32 1.442695, %v330_v5 }
 0x367   :  { %541 = vpow2.f32 %v331_v6 }
 0x371   :  { %v542_v7 = vpop.eup %541 }
 0x372   :  { %v333_v8 = vsel %vm326_vm2, %v542_v7, 0.0 }
 0x373   :  { %334 = vadd.xlane.f32.xlu0 %v333_v8 }
 0x400   :  { %v335_v9 = vpop.xlane.xlu0 %334 }
 0x401   :  { %543 = vrcp.f32 %v335_v9 }
 0x40b   :  { %v544_v10 = vpop.eup %543 }
 0x40c   :  { %v337_v11 = vmul.f32 %v544_v10, %v333_v8 }
 0x40e   :  { %338 = vst [vmem:[#allocation10] sm:$0xff] %v337_v11 }
 0x40f   :  { %644 = shalt.err (!%p641_p8)
}
 0x410   :  { %s645_s1 = scalar_lea.hbm %s792_s4, 128 }
 0x411   :  { %p646_p9 = scmp.ne.s32.totalorder %s792_s4, %s645_s1  ;;  %p649_p10 = scmp.lt.u32.totalorder %s645_s1, %s792_s4 }
 0x413   :  { %p651_p11 = pnand %p649_p10, %p646_p9 }
 0x415   :  { %654 = shalt.err (!%p651_p11)
}
 0x416   :  { %348 = dma.vmem_to_hbm [thread:$0]  %s346_s25, 128, %s792_s4, [#allocation4]  }
 0x417   :  { %661 = dma.done.wait [#allocation4], 128  }
 0x418   :  { %662 = vsyncadd [#allocation4], 4294967168 }
 0x419   :  { %352 = vsyncpa [#allocation3], 1 }
 0x41a   :  { %353 = vsyncpa [#allocation6], 1 }
 0x41b   :  { %354 = vsyncpa [#allocation9], 1 }
 0x41c   :  { %355 = vsyncpa [#allocation4], 1 }

</bundles_post_ra>
